<compile_context>
chip_gen: v6e
topology: v6e:2x2x1
jax: 0.10.0
libtpu: 0.0.40
codegen_flags: <defaults>
</compile_context>

<pallas_src>
import jax
import jax.numpy as jnp
from jax.experimental import pallas as pl
from jax.experimental.pallas import tpu as pltpu

_BN_EPS = 1e-5
_LANE = 128
_MIB = 1024 * 1024


def _round_up(n, m):
    return (n + m - 1) // m * m


def _make_resblock_kernel(*, n_rows, l_out, k_taps, pad, cp_out, has_proj,
                          compute_dtype):
    inv_n = 1.0 / float(n_rows)

    def _bn(y, g_ref, b_ref):
        # Training-mode BatchNorm1d, one-pass f32 stats -> per-channel FMA.
        mean = jnp.sum(y, axis=0, keepdims=True) * inv_n            # E[x]
        ex2 = jnp.sum(y * y, axis=0, keepdims=True) * inv_n         # E[x^2]
        var = ex2 - mean * mean
        scale = g_ref[...] * jax.lax.rsqrt(var + _BN_EPS)           # (1, C)
        shift = b_ref[...] - mean * scale                           # (1, C)
        return y * scale + shift

    def _conv2_taps(h1, rloc):
        # "Same"-padded conv2 taps built from h1 via XLU sublane rotations and
        # masked zeroing (no padded VMEM scratch, no sublane-offset stores).
        # Each tap is cast to the MXU dtype before the lane-concat so the big
        # (n_rows, K*cp_out) im2col temporary is half-width in bf16 mode.
        taps = []
        for k in range(k_taps):
            s = k - pad                               # tap_k[j] = h1[j + s]
            if s == 0:
                taps.append(h1.astype(compute_dtype))
            else:
                t = pltpu.roll(h1, (-s) % n_rows, axis=0)
                valid = jnp.logical_and(rloc + s >= 0, rloc + s < l_out)
                taps.append(jnp.where(valid, t, 0.0).astype(compute_dtype))
        return taps[0] if k_taps == 1 else jnp.concatenate(taps, axis=-1)

    def kernel(a1_ref, rloc_ref, w1_ref, g1_ref, b1_ref, w2_ref, g2_ref,
               b2_ref, *rest):
        if has_proj:
            gs_ref, bs_ref, o_ref = rest
        else:
            xid_ref, o_ref = rest

        # ---- conv1 (+ fused 1x1 shortcut projection): one MXU matmul ------
        # a1: wrapper-built packed im2col (B*Lout, round_up(K*Cin,128));
        # when has_proj, w1 has 2*cp_out columns: [conv1 | shortcut].
        c_all = jnp.dot(a1_ref[...], w1_ref[...],
                        preferred_element_type=jnp.float32)
        h1 = jnp.maximum(_bn(c_all[:, :cp_out], g1_ref, b1_ref), 0.0)

        # ---- conv2 ---------------------------------------------------------
        a2 = _conv2_taps(h1, rloc_ref[...])           # (B*Lout, K*cp_out)
        c2 = jnp.dot(a2, w2_ref[...], preferred_element_type=jnp.float32)
        out = _bn(c2, g2_ref, b2_ref)

        # ---- shortcut -------------------------------------------------------
        if has_proj:
            sc = _bn(c_all[:, cp_out:], gs_ref, bs_ref)
        else:
            sc = xid_ref[...]                         # identity (stride == 1)

        o_ref[...] = jnp.maximum(out + sc, 0.0)       # lane-dense store

    return kernel


def residual_block(x, params, *, stride=1, kernel_size=5,
                   compute_dtype=jnp.bfloat16):
    """x: (B, Cin, L) float32 (PyTorch NCL layout). Returns (B, Cout, Lout)."""
    b, c_in, l_in = x.shape
    c_out = params["w1"].shape[0]
    k = kernel_size
    pad = (k - 1) // 2
    has_proj = (stride != 1) or (c_in != c_out)
    l_out = (l_in + 2 * pad - k) // stride + 1
    n_rows = b * l_out
    cp_out = _round_up(c_out, _LANE)
    d1 = _round_up(k * c_in, _LANE)        # conv1 contraction (packed taps)
    d2 = k * cp_out                        # conv2 contraction (in-kernel taps)
    n_cols = 2 * cp_out if has_proj else cp_out

    # ---- wrapper-side packed im2col for conv1 (strided output rows only) ---
    # TODO(synk): for C_in >= 128 switch to an in-kernel tap stack from a 1x
    # channels-padded input to avoid the K-fold HBM read of x.
    x_nlc = jnp.transpose(x, (0, 2, 1)).astype(jnp.float32)       # (B, L, Cin)
    x_pl = jnp.pad(x_nlc, ((0, 0), (pad, pad), (0, 0)))
    taps = [x_pl[:, t:t + (l_out - 1) * stride + 1:stride, :] for t in range(k)]
    a1 = jnp.concatenate(taps, axis=-1).reshape(n_rows, k * c_in)
    a1 = jnp.pad(a1, ((0, 0), (0, d1 - k * c_in))).astype(compute_dtype)

    # per-row local position (for conv2's "same"-padding masks)
    rloc = jnp.tile(jnp.arange(l_out, dtype=jnp.int32), b)[:, None]

    def prep_vec(v):                       # (Cout,) -> (1, cp_out) f32, zeros
        return jnp.pad(v, (0, cp_out - v.shape[0]))[None, :].astype(jnp.float32)

    # conv1 weight (Cout, Cin, K) -> (K*Cin packed, cp_out); shortcut fused.
    w1_mat = jnp.transpose(params["w1"], (2, 1, 0)).reshape(k * c_in, c_out)
    w1f = jnp.pad(w1_mat, ((0, d1 - k * c_in), (0, cp_out - c_out)))
    if has_proj:
        ws_mat = jnp.transpose(params["ws"][:, :, 0])              # (Cin, Cout)
        ws_blk = jnp.zeros((d1, cp_out), jnp.float32)
        ws_blk = ws_blk.at[pad * c_in:(pad + 1) * c_in, :c_out].set(ws_mat)
        w1f = jnp.concatenate([w1f, ws_blk], axis=-1)              # (d1, 2cp)
    w1f = w1f.astype(compute_dtype)

    # conv2 weight (Cout, Cout, K) -> (K*cp_out, cp_out), channel-padded taps.
    w2_t = jnp.pad(jnp.transpose(params["w2"], (2, 1, 0)),
                   ((0, 0), (0, cp_out - c_out), (0, cp_out - c_out)))
    w2f = w2_t.reshape(d2, cp_out).astype(compute_dtype)

    inputs = [a1, rloc, w1f, prep_vec(params["g1"]), prep_vec(params["b1"]),
              w2f, prep_vec(params["g2"]), prep_vec(params["b2"])]
    if has_proj:
        inputs += [prep_vec(params["gs"]), prep_vec(params["bs"])]
    else:
        # identity shortcut: channels-padded, length-UNpadded x (no in-kernel
        # sublane-offset slice of the padded input).
        xid = jnp.pad(x_nlc, ((0, 0), (0, 0), (0, cp_out - c_in)))
        inputs.append(xid.reshape(n_rows, cp_out).astype(jnp.float32))

    kernel = _make_resblock_kernel(
        n_rows=n_rows, l_out=l_out, k_taps=k, pad=pad, cp_out=cp_out,
        has_proj=has_proj, compute_dtype=compute_dtype)

    # VMEM budget from the actual footprint, clamped to v7x's 64 MiB physical.
    cbytes = jnp.finfo(compute_dtype).bits // 8
    io_bytes = sum(int(a.size) * a.dtype.itemsize for a in inputs)
    io_bytes += n_rows * cp_out * 4                                # output
    tmp_bytes = (n_rows * n_cols * 4            # c_all (f32)
                 + n_rows * cp_out * 4 * 3      # h1 / c2 / bn temporaries
                 + n_rows * d2 * cbytes)        # conv2 im2col stack
    vmem_limit = int(min(64 * _MIB, max(8 * _MIB, 2 * (io_bytes + tmp_bytes))))

    # TODO(synk): for long sequences (footprint > ~48 MiB) grid over B*L row
    # tiles with streamed per-channel sum/sumsq BN accumulators finalised
    # under pl.when (accumulate-then-apply), mark the row-tile axis "parallel"
    # for v7x's two TensorCores, and keep the padded (B, L, Cp) layout between
    # chained blocks to drop the per-block NCL<->NLC transposes.
    out2d = pl.pallas_call(
        kernel,
        out_shape=jax.ShapeDtypeStruct((n_rows, cp_out), jnp.float32),
        in_specs=[pl.BlockSpec(memory_space=pltpu.MemorySpace.VMEM)]
        * len(inputs),
        out_specs=pl.BlockSpec(memory_space=pltpu.MemorySpace.VMEM),
        compiler_params=pltpu.CompilerParams(vmem_limit_bytes=vmem_limit),
    )(*inputs)

    out = out2d.reshape(b, l_out, cp_out)[:, :, :c_out]
    return jnp.transpose(out, (0, 2, 1))                           # back to NCL


def residual_block_ref(x, params, *, stride=1, kernel_size=5):
    """Pure-JAX reference (lax.conv + batch-stat BN) for verification."""
    pad = (kernel_size - 1) // 2
    c_in = x.shape[1]
    c_out = params["w1"].shape[0]
    has_proj = (stride != 1) or (c_in != c_out)
    dn = ("NCH", "OIH", "NCH")

    def conv(y, w, s, p):
        return jax.lax.conv_general_dilated(y, w, (s,), [(p, p)],
                                            dimension_numbers=dn)

    def bn(y, g, bb):
        mean = y.mean(axis=(0, 2), keepdims=True)
        var = ((y - mean) ** 2).mean(axis=(0, 2), keepdims=True)
        return ((y - mean) / jnp.sqrt(var + _BN_EPS)
                * g[None, :, None] + bb[None, :, None])

    out = jax.nn.relu(bn(conv(x, params["w1"], stride, pad),
                         params["g1"], params["b1"]))
    out = bn(conv(out, params["w2"], 1, pad), params["g2"], params["b2"])
    if has_proj:
        sc = bn(conv(x, params["ws"], stride, 0), params["gs"], params["bs"])
    else:
        sc = x
    return jax.nn.relu(out + sc)


def init_params(key, c_in, c_out, kernel_size, stride):
    ks = jax.random.split(key, 9)
    p = {
        "w1": 0.1 * jax.random.normal(ks[0], (c_out, c_in, kernel_size),
                                      jnp.float32),
        "g1": 1.0 + 0.1 * jax.random.normal(ks[1], (c_out,), jnp.float32),
        "b1": 0.1 * jax.random.normal(ks[2], (c_out,), jnp.float32),
        "w2": 0.1 * jax.random.normal(ks[3], (c_out, c_out, kernel_size),
                                      jnp.float32),
        "g2": 1.0 + 0.1 * jax.random.normal(ks[4], (c_out,), jnp.float32),
        "b2": 0.1 * jax.random.normal(ks[5], (c_out,), jnp.float32),
    }
    if stride != 1 or c_in != c_out:
        p["ws"] = 0.1 * jax.random.normal(ks[6], (c_out, c_in, 1), jnp.float32)
        p["gs"] = 1.0 + 0.1 * jax.random.normal(ks[7], (c_out,), jnp.float32)
        p["bs"] = 0.1 * jax.random.normal(ks[8], (c_out,), jnp.float32)
    return p


if __name__ == "__main__":
    key = jax.random.PRNGKey(0)

    configs = [
        # (B, Cin, Cout, L, K, stride)
        (2, 4, 8, 16, 5, 1),    # projection shortcut (Cin != Cout)
        (2, 8, 8, 16, 5, 1),    # identity shortcut
        (2, 4, 8, 16, 5, 2),    # strided projection shortcut
    ]
    for (B, C_IN, C_OUT, L, K, STRIDE) in configs:
        key, k_x, k_p = jax.random.split(key, 3)
        x = jax.random.normal(k_x, (B, C_IN, L), jnp.float32)
        params = init_params(k_p, C_IN, C_OUT, K, STRIDE)

        ref = jax.block_until_ready(
            residual_block_ref(x, params, stride=STRIDE, kernel_size=K))

        # exact-parity path: f32 MXU inputs
        out_f32 = jax.block_until_ready(
            residual_block(x, params, stride=STRIDE, kernel_size=K,
                           compute_dtype=jnp.float32))
        assert out_f32.shape == ref.shape, (out_f32.shape, ref.shape)
        assert jnp.allclose(out_f32, ref, rtol=1e-4, atol=1e-4), (
            float(jnp.max(jnp.abs(out_f32 - ref))))

        # fast path (default on all generations): bf16 MXU inputs, f32 accum
        out_bf16 = jax.block_until_ready(
            residual_block(x, params, stride=STRIDE, kernel_size=K,
                           compute_dtype=jnp.bfloat16))
        assert out_bf16.shape == ref.shape, (out_bf16.shape, ref.shape)
        assert jnp.allclose(out_bf16, ref, rtol=5e-2, atol=5e-2), (
            float(jnp.max(jnp.abs(out_bf16 - ref))))

    print("KERNEL_OK")
</pallas_src>

<mosaic_0001>
module attributes {stable_mosaic.version = 11 : i64} {
  func.func @kernel(%arg0: memref<32x128xf32, #tpu.memory_space<vmem>>, %arg1: memref<32x1xi32, #tpu.memory_space<vmem>>, %arg2: memref<128x256xf32, #tpu.memory_space<vmem>>, %arg3: memref<1x128xf32, #tpu.memory_space<vmem>>, %arg4: memref<1x128xf32, #tpu.memory_space<vmem>>, %arg5: memref<640x128xf32, #tpu.memory_space<vmem>>, %arg6: memref<1x128xf32, #tpu.memory_space<vmem>>, %arg7: memref<1x128xf32, #tpu.memory_space<vmem>>, %arg8: memref<1x128xf32, #tpu.memory_space<vmem>>, %arg9: memref<1x128xf32, #tpu.memory_space<vmem>>, %arg10: memref<32x128xf32, #tpu.memory_space<vmem>>) attributes {dimension_semantics = [], scalar_prefetch = 0 : i64, scratch_operands = 0 : i64, tpu.core_type = #tpu.core_type<tc>} {
    %c0 = arith.constant 0 : index
    %c0_0 = arith.constant 0 : index
    %0 = vector.load %arg0[%c0, %c0_0] : memref<32x128xf32, #tpu.memory_space<vmem>>, vector<32x128xf32>
    %c0_1 = arith.constant 0 : index
    %c0_2 = arith.constant 0 : index
    %1 = vector.load %arg2[%c0_1, %c0_2] : memref<128x256xf32, #tpu.memory_space<vmem>>, vector<128x256xf32>
    %cst = arith.constant dense<0.000000e+00> : vector<32x256xf32>
    %2 = tpu.matmul %0, %1, %cst {dimension_numbers = #tpu.dot_dimension_numbers<[1], [0], [0], [1], [0, 0, 1, 1], [], []>} : vector<32x128xf32>, vector<128x256xf32>, vector<32x256xf32> -> vector<32x256xf32>
    %3 = vector.extract_strided_slice %2 {offsets = [0, 0], sizes = [32, 128], strides = [1, 1]} : vector<32x256xf32> to vector<32x128xf32>
    %cst_3 = arith.constant dense<0.000000e+00> : vector<128xf32>
    %4 = vector.multi_reduction <add>, %3, %cst_3 [0] : vector<32x128xf32> to vector<128xf32>
    %5 = vector.shape_cast %4 : vector<128xf32> to vector<1x128xf32>
    %cst_4 = arith.constant 3.125000e-02 : f32
    %6 = vector.broadcast %cst_4 : f32 to vector<1x128xf32>
    %7 = arith.mulf %5, %6 : vector<1x128xf32>
    %8 = arith.mulf %3, %3 : vector<32x128xf32>
    %cst_5 = arith.constant dense<0.000000e+00> : vector<128xf32>
    %9 = vector.multi_reduction <add>, %8, %cst_5 [0] : vector<32x128xf32> to vector<128xf32>
    %10 = vector.shape_cast %9 : vector<128xf32> to vector<1x128xf32>
    %cst_6 = arith.constant 3.125000e-02 : f32
    %11 = vector.broadcast %cst_6 : f32 to vector<1x128xf32>
    %12 = arith.mulf %10, %11 : vector<1x128xf32>
    %13 = arith.mulf %7, %7 : vector<1x128xf32>
    %14 = arith.subf %12, %13 : vector<1x128xf32>
    %c0_7 = arith.constant 0 : index
    %c0_8 = arith.constant 0 : index
    %15 = vector.load %arg3[%c0_7, %c0_8] : memref<1x128xf32, #tpu.memory_space<vmem>>, vector<1x128xf32>
    %cst_9 = arith.constant 9.99999974E-6 : f32
    %16 = vector.broadcast %cst_9 : f32 to vector<1x128xf32>
    %17 = arith.addf %14, %16 : vector<1x128xf32>
    %18 = math.rsqrt %17 : vector<1x128xf32>
    %19 = arith.mulf %15, %18 : vector<1x128xf32>
    %c0_10 = arith.constant 0 : index
    %c0_11 = arith.constant 0 : index
    %20 = vector.load %arg4[%c0_10, %c0_11] : memref<1x128xf32, #tpu.memory_space<vmem>>, vector<1x128xf32>
    %21 = arith.mulf %7, %19 : vector<1x128xf32>
    %22 = arith.subf %20, %21 : vector<1x128xf32>
    %23 = vector.broadcast %19 : vector<1x128xf32> to vector<32x128xf32>
    %24 = arith.mulf %3, %23 : vector<32x128xf32>
    %25 = vector.broadcast %22 : vector<1x128xf32> to vector<32x128xf32>
    %26 = arith.addf %24, %25 : vector<32x128xf32>
    %cst_12 = arith.constant 0.000000e+00 : f32
    %27 = vector.broadcast %cst_12 : f32 to vector<32x128xf32>
    %28 = arith.maximumf %26, %27 : vector<32x128xf32>
    %c0_13 = arith.constant 0 : index
    %c0_14 = arith.constant 0 : index
    %29 = vector.load %arg1[%c0_13, %c0_14] : memref<32x1xi32, #tpu.memory_space<vmem>>, vector<32x1xi32>
    %c2_i32 = arith.constant 2 : i32
    %30 = tpu.dynamic_rotate %28 by %c2_i32 dim 0 : vector<32x128xf32>, i32 -> vector<32x128xf32>
    %c-2_i32 = arith.constant -2 : i32
    %31 = vector.broadcast %c-2_i32 : i32 to vector<32x1xi32>
    %32 = arith.addi %29, %31 : vector<32x1xi32>
    %c0_i32 = arith.constant 0 : i32
    %33 = vector.broadcast %c0_i32 : i32 to vector<32x1xi32>
    %34 = arith.cmpi sge, %32, %33 : vector<32x1xi32>
    %c-2_i32_15 = arith.constant -2 : i32
    %35 = vector.broadcast %c-2_i32_15 : i32 to vector<32x1xi32>
    %36 = arith.addi %29, %35 : vector<32x1xi32>
    %c16_i32 = arith.constant 16 : i32
    %37 = vector.broadcast %c16_i32 : i32 to vector<32x1xi32>
    %38 = arith.cmpi slt, %36, %37 : vector<32x1xi32>
    %39 = arith.andi %34, %38 : vector<32x1xi1>
    %cst_16 = arith.constant 0.000000e+00 : f32
    %40 = vector.shape_cast %39 : vector<32x1xi1> to vector<32x1xi1>
    %41 = vector.broadcast %40 : vector<32x1xi1> to vector<32x128xi1>
    %42 = vector.broadcast %cst_16 : f32 to vector<32x128xf32>
    %43 = arith.select %41, %30, %42 : vector<32x128xi1>, vector<32x128xf32>
    %c1_i32 = arith.constant 1 : i32
    %44 = tpu.dynamic_rotate %28 by %c1_i32 dim 0 : vector<32x128xf32>, i32 -> vector<32x128xf32>
    %c-1_i32 = arith.constant -1 : i32
    %45 = vector.broadcast %c-1_i32 : i32 to vector<32x1xi32>
    %46 = arith.addi %29, %45 : vector<32x1xi32>
    %c0_i32_17 = arith.constant 0 : i32
    %47 = vector.broadcast %c0_i32_17 : i32 to vector<32x1xi32>
    %48 = arith.cmpi sge, %46, %47 : vector<32x1xi32>
    %c-1_i32_18 = arith.constant -1 : i32
    %49 = vector.broadcast %c-1_i32_18 : i32 to vector<32x1xi32>
    %50 = arith.addi %29, %49 : vector<32x1xi32>
    %c16_i32_19 = arith.constant 16 : i32
    %51 = vector.broadcast %c16_i32_19 : i32 to vector<32x1xi32>
    %52 = arith.cmpi slt, %50, %51 : vector<32x1xi32>
    %53 = arith.andi %48, %52 : vector<32x1xi1>
    %cst_20 = arith.constant 0.000000e+00 : f32
    %54 = vector.shape_cast %53 : vector<32x1xi1> to vector<32x1xi1>
    %55 = vector.broadcast %54 : vector<32x1xi1> to vector<32x128xi1>
    %56 = vector.broadcast %cst_20 : f32 to vector<32x128xf32>
    %57 = arith.select %55, %44, %56 : vector<32x128xi1>, vector<32x128xf32>
    %c31_i32 = arith.constant 31 : i32
    %58 = tpu.dynamic_rotate %28 by %c31_i32 dim 0 : vector<32x128xf32>, i32 -> vector<32x128xf32>
    %c1_i32_21 = arith.constant 1 : i32
    %59 = vector.broadcast %c1_i32_21 : i32 to vector<32x1xi32>
    %60 = arith.addi %29, %59 : vector<32x1xi32>
    %c0_i32_22 = arith.constant 0 : i32
    %61 = vector.broadcast %c0_i32_22 : i32 to vector<32x1xi32>
    %62 = arith.cmpi sge, %60, %61 : vector<32x1xi32>
    %c1_i32_23 = arith.constant 1 : i32
    %63 = vector.broadcast %c1_i32_23 : i32 to vector<32x1xi32>
    %64 = arith.addi %29, %63 : vector<32x1xi32>
    %c16_i32_24 = arith.constant 16 : i32
    %65 = vector.broadcast %c16_i32_24 : i32 to vector<32x1xi32>
    %66 = arith.cmpi slt, %64, %65 : vector<32x1xi32>
    %67 = arith.andi %62, %66 : vector<32x1xi1>
    %cst_25 = arith.constant 0.000000e+00 : f32
    %68 = vector.shape_cast %67 : vector<32x1xi1> to vector<32x1xi1>
    %69 = vector.broadcast %68 : vector<32x1xi1> to vector<32x128xi1>
    %70 = vector.broadcast %cst_25 : f32 to vector<32x128xf32>
    %71 = arith.select %69, %58, %70 : vector<32x128xi1>, vector<32x128xf32>
    %c30_i32 = arith.constant 30 : i32
    %72 = tpu.dynamic_rotate %28 by %c30_i32 dim 0 : vector<32x128xf32>, i32 -> vector<32x128xf32>
    %c2_i32_26 = arith.constant 2 : i32
    %73 = vector.broadcast %c2_i32_26 : i32 to vector<32x1xi32>
    %74 = arith.addi %29, %73 : vector<32x1xi32>
    %c0_i32_27 = arith.constant 0 : i32
    %75 = vector.broadcast %c0_i32_27 : i32 to vector<32x1xi32>
    %76 = arith.cmpi sge, %74, %75 : vector<32x1xi32>
    %c2_i32_28 = arith.constant 2 : i32
    %77 = vector.broadcast %c2_i32_28 : i32 to vector<32x1xi32>
    %78 = arith.addi %29, %77 : vector<32x1xi32>
    %c16_i32_29 = arith.constant 16 : i32
    %79 = vector.broadcast %c16_i32_29 : i32 to vector<32x1xi32>
    %80 = arith.cmpi slt, %78, %79 : vector<32x1xi32>
    %81 = arith.andi %76, %80 : vector<32x1xi1>
    %cst_30 = arith.constant 0.000000e+00 : f32
    %82 = vector.shape_cast %81 : vector<32x1xi1> to vector<32x1xi1>
    %83 = vector.broadcast %82 : vector<32x1xi1> to vector<32x128xi1>
    %84 = vector.broadcast %cst_30 : f32 to vector<32x128xf32>
    %85 = arith.select %83, %72, %84 : vector<32x128xi1>, vector<32x128xf32>
    %86 = tpu.concatenate %43, %57, %28, %71, %85 in 1 : vector<32x128xf32>, vector<32x128xf32>, vector<32x128xf32>, vector<32x128xf32>, vector<32x128xf32> -> vector<32x640xf32>
    %c0_31 = arith.constant 0 : index
    %c0_32 = arith.constant 0 : index
    %87 = vector.load %arg5[%c0_31, %c0_32] : memref<640x128xf32, #tpu.memory_space<vmem>>, vector<640x128xf32>
    %cst_33 = arith.constant dense<0.000000e+00> : vector<32x128xf32>
    %88 = tpu.matmul %86, %87, %cst_33 {dimension_numbers = #tpu.dot_dimension_numbers<[1], [0], [0], [1], [0, 0, 1, 1], [], []>} : vector<32x640xf32>, vector<640x128xf32>, vector<32x128xf32> -> vector<32x128xf32>
    %cst_34 = arith.constant dense<0.000000e+00> : vector<128xf32>
    %89 = vector.multi_reduction <add>, %88, %cst_34 [0] : vector<32x128xf32> to vector<128xf32>
    %90 = vector.shape_cast %89 : vector<128xf32> to vector<1x128xf32>
    %cst_35 = arith.constant 3.125000e-02 : f32
    %91 = vector.broadcast %cst_35 : f32 to vector<1x128xf32>
    %92 = arith.mulf %90, %91 : vector<1x128xf32>
    %93 = arith.mulf %88, %88 : vector<32x128xf32>
    %cst_36 = arith.constant dense<0.000000e+00> : vector<128xf32>
    %94 = vector.multi_reduction <add>, %93, %cst_36 [0] : vector<32x128xf32> to vector<128xf32>
    %95 = vector.shape_cast %94 : vector<128xf32> to vector<1x128xf32>
    %cst_37 = arith.constant 3.125000e-02 : f32
    %96 = vector.broadcast %cst_37 : f32 to vector<1x128xf32>
    %97 = arith.mulf %95, %96 : vector<1x128xf32>
    %98 = arith.mulf %92, %92 : vector<1x128xf32>
    %99 = arith.subf %97, %98 : vector<1x128xf32>
    %c0_38 = arith.constant 0 : index
    %c0_39 = arith.constant 0 : index
    %100 = vector.load %arg6[%c0_38, %c0_39] : memref<1x128xf32, #tpu.memory_space<vmem>>, vector<1x128xf32>
    %cst_40 = arith.constant 9.99999974E-6 : f32
    %101 = vector.broadcast %cst_40 : f32 to vector<1x128xf32>
    %102 = arith.addf %99, %101 : vector<1x128xf32>
    %103 = math.rsqrt %102 : vector<1x128xf32>
    %104 = arith.mulf %100, %103 : vector<1x128xf32>
    %c0_41 = arith.constant 0 : index
    %c0_42 = arith.constant 0 : index
    %105 = vector.load %arg7[%c0_41, %c0_42] : memref<1x128xf32, #tpu.memory_space<vmem>>, vector<1x128xf32>
    %106 = arith.mulf %92, %104 : vector<1x128xf32>
    %107 = arith.subf %105, %106 : vector<1x128xf32>
    %108 = vector.broadcast %104 : vector<1x128xf32> to vector<32x128xf32>
    %109 = arith.mulf %88, %108 : vector<32x128xf32>
    %110 = vector.broadcast %107 : vector<1x128xf32> to vector<32x128xf32>
    %111 = arith.addf %109, %110 : vector<32x128xf32>
    %112 = vector.extract_strided_slice %2 {offsets = [0, 128], sizes = [32, 128], strides = [1, 1]} : vector<32x256xf32> to vector<32x128xf32>
    %cst_43 = arith.constant dense<0.000000e+00> : vector<128xf32>
    %113 = vector.multi_reduction <add>, %112, %cst_43 [0] : vector<32x128xf32> to vector<128xf32>
    %114 = vector.shape_cast %113 : vector<128xf32> to vector<1x128xf32>
    %cst_44 = arith.constant 3.125000e-02 : f32
    %115 = vector.broadcast %cst_44 : f32 to vector<1x128xf32>
    %116 = arith.mulf %114, %115 : vector<1x128xf32>
    %117 = arith.mulf %112, %112 : vector<32x128xf32>
    %cst_45 = arith.constant dense<0.000000e+00> : vector<128xf32>
    %118 = vector.multi_reduction <add>, %117, %cst_45 [0] : vector<32x128xf32> to vector<128xf32>
    %119 = vector.shape_cast %118 : vector<128xf32> to vector<1x128xf32>
    %cst_46 = arith.constant 3.125000e-02 : f32
    %120 = vector.broadcast %cst_46 : f32 to vector<1x128xf32>
    %121 = arith.mulf %119, %120 : vector<1x128xf32>
    %122 = arith.mulf %116, %116 : vector<1x128xf32>
    %123 = arith.subf %121, %122 : vector<1x128xf32>
    %c0_47 = arith.constant 0 : index
    %c0_48 = arith.constant 0 : index
    %124 = vector.load %arg8[%c0_47, %c0_48] : memref<1x128xf32, #tpu.memory_space<vmem>>, vector<1x128xf32>
    %cst_49 = arith.constant 9.99999974E-6 : f32
    %125 = vector.broadcast %cst_49 : f32 to vector<1x128xf32>
    %126 = arith.addf %123, %125 : vector<1x128xf32>
    %127 = math.rsqrt %126 : vector<1x128xf32>
    %128 = arith.mulf %124, %127 : vector<1x128xf32>
    %c0_50 = arith.constant 0 : index
    %c0_51 = arith.constant 0 : index
    %129 = vector.load %arg9[%c0_50, %c0_51] : memref<1x128xf32, #tpu.memory_space<vmem>>, vector<1x128xf32>
    %130 = arith.mulf %116, %128 : vector<1x128xf32>
    %131 = arith.subf %129, %130 : vector<1x128xf32>
    %132 = vector.broadcast %128 : vector<1x128xf32> to vector<32x128xf32>
    %133 = arith.mulf %112, %132 : vector<32x128xf32>
    %134 = vector.broadcast %131 : vector<1x128xf32> to vector<32x128xf32>
    %135 = arith.addf %133, %134 : vector<32x128xf32>
    %136 = arith.addf %111, %135 : vector<32x128xf32>
    %cst_52 = arith.constant 0.000000e+00 : f32
    %137 = vector.broadcast %cst_52 : f32 to vector<32x128xf32>
    %138 = arith.maximumf %136, %137 : vector<32x128xf32>
    %c0_53 = arith.constant 0 : index
    %c0_54 = arith.constant 0 : index
    %139 = vector.load %arg10[%c0_53, %c0_54] : memref<32x128xf32, #tpu.memory_space<vmem>>, vector<32x128xf32>
    tpu.vector_store %arg10[%c0_53, %c0_54], %138 {strides = array<i32>} : memref<32x128xf32, #tpu.memory_space<vmem>>, vector<32x128xf32>,
    return
  }
}

</mosaic_0001>

<bundles_post_ra>
// kernel: tpu_custom_call.1
= control target key start
LH: loop header
LB: loop body
LE: loop exit
PB: predicated region body
PF: predicated region fallthrough
CT: control target
= control target key end

     0   :  { %15 = vsyncpa [#allocation3], 0  ;;  %s1533_s0 = inlined_call_operand.vmem [shape: f32[32,128], index: 0, kind: input, shape index: {}]   ;;  %s1534_s1 = inlined_call_operand.vmem [shape: s32[32,1], index: 1, kind: input, shape index: {}]   ;;  %s1535_s2 = inlined_call_operand.hbm [shape: f32[128,256], index: 2, kind: input, shape index: {}]   ;;  %s1536_s3 = inlined_call_operand.vmem [shape: f32[1,128], index: 3, kind: input, shape index: {}]   ;;  %s1537_s4 = inlined_call_operand.vmem [shape: f32[1,128], index: 4, kind: input, shape index: {}]   ;;  %s1538_s5 = inlined_call_operand.hbm [shape: f32[640,128], index: 5, kind: input, shape index: {}]   ;;  %s1539_s6 = inlined_call_operand.vmem [shape: f32[1,128], index: 6, kind: input, shape index: {}]   ;;  %s1540_s7 = inlined_call_operand.vmem [shape: f32[1,128], index: 7, kind: input, shape index: {}]   ;;  %s1541_s8 = inlined_call_operand.vmem [shape: f32[1,128], index: 8, kind: input, shape index: {}]   ;;  %s1542_s9 = inlined_call_operand.vmem [shape: f32[1,128], index: 9, kind: input, shape index: {}]   ;;  %s1543_s10 = inlined_call_operand.hbm [shape: f32[32,128], index: 10, kind: output, shape index: {}]  }
   0x1   :  { %16 = vsyncpa [#allocation6], 0 }
   0x2   :  { %17 = vsyncpa [#allocation4], 0  ;;  %s1164_s13 = smov [#allocation2]  }
   0x3   :  { %s27_s14 = sshll.u32 %s1164_s13, 4  ;;  %s28_s14 = int_to_ptr.vmem [resolvable:$true] %s27_s14 }
   0x4   :  { %s1106_s15 = scalar_lea.vmem %s28_s14, 4096  ;;  %p1111_p1 = scmp.lt.s32.totalorder %s28_s14, %s28_s14 }
   0x5   :  { %p1107_p0 = scmp.ne.s32.totalorder %s28_s14, %s1106_s15  ;;  %p1112_p2 = scmp.lt.s32.totalorder %s1106_s15, %s1106_s15 }
   0x7   :  { %p1113_p3 = por %p1112_p2, %p1111_p1 }
   0x9   :  { %p1114_p4 = pnand %p1113_p3, %p1107_p0 }
   0xb   :  { %1117 = shalt.err (!%p1114_p4)
}
   0xc   :  { %s1165_s16 = smov 256   ;;  %s1166_s17 = smov 16  }
   0xd   :  { %33 = dma.hbm_to_vmem [thread:$0]  %s1535_s2, 4096, %s28_s14, [#allocation3], %s1165_s16, %s1165_s16, %s1166_s17  }
   0xe   :  { %s1167_s20 = smov [#allocation5]  }
   0xf   :  { %s43_s21 = sshll.u32 %s1167_s20, 4  ;;  %s44_s21 = int_to_ptr.vmem [resolvable:$true] %s43_s21 }
  0x10   :  { %s1126_s22 = scalar_lea.vmem %s44_s21, 10240  ;;  %p1131_p6 = scmp.lt.s32.totalorder %s44_s21, %s44_s21 }
  0x11   :  { %p1127_p5 = scmp.ne.s32.totalorder %s44_s21, %s1126_s22  ;;  %p1132_p7 = scmp.lt.s32.totalorder %s1126_s22, %s1126_s22 }
  0x13   :  { %p1133_p8 = por %p1132_p7, %p1131_p6 }
  0x15   :  { %p1134_p9 = pnand %p1133_p8, %p1127_p5 }
  0x17   :  { %1137 = shalt.err (!%p1134_p9)
}
  0x18   :  { %s1168_s23 = smov 128   ;;  %s1169_s24 = smov 8  }
  0x19   :  { %49 = dma.hbm_to_vmem [thread:$0]  %s1538_s5, 10240, %s44_s21, [#allocation6], %s1168_s23, %s1168_s23, %s1169_s24  }
  0x1a   :  { %1158 = dma.done.wait [#allocation3], 4096  }
  0x1b   :  { %1159 = vsyncadd [#allocation3], 4294963200 }
  0x1c   :  { %1160 = dma.done.wait [#allocation6], 10240  }
  0x1d   :  { %1161 = vsyncadd [#allocation6], 4294957056  ;;  %v1170_v0 = vmov 0.0   ;;  %v1171_v1 = vmov 0   ;;  %v99_v2 = vld [vmem:[#allocation2 + $0xf8] sm:$0xff]  ;;  %v98_v3 = vld [vmem:[#allocation2 + $0xf0] sm:$0xff] }
  0x1e   :  { %164 = vmatprep.mubr.f32.mxu0 %v1170_v0  ;;  %1090 = vset.pattern.permute.xlu0 %v1171_v1  ;;  %v97_v4 = vld [vmem:[#allocation2 + $0xe8] sm:$0xff]  ;;  %v96_v5 = vld [vmem:[#allocation2 + $0xe0] sm:$0xff]  ;;  %v95_v6 = vld [vmem:[#allocation2 + $0xd8] sm:$0xff] }
  0x1f   :  { %1091 = vset.pattern.permute.xlu1 %v1171_v1  ;;  %100 = vmatprep.subr.mxu0 %v99_v2  ;;  %v94_v7 = vld [vmem:[#allocation2 + $0xd0] sm:$0xff]  ;;  %v93_v8 = vld [vmem:[#allocation2 + $0xc8] sm:$0xff]  ;;  %v92_v9 = vld [vmem:[#allocation2 + $0xc0] sm:$0xff] }
  0x20   :  { %101 = vmatpush1.msra.mxu0 %v98_v3  ;;  %v91_v10 = vld [vmem:[#allocation2 + $0xb8] sm:$0xff]  ;;  %v90_v11 = vld [vmem:[#allocation2 + $0xb0] sm:$0xff]  ;;  %v89_v12 = vld [vmem:[#allocation2 + $0xa8] sm:$0xff] }
  0x21   :  { %102 = vmatprep.subr.mxu0 %v97_v4  ;;  %v88_v13 = vld [vmem:[#allocation2 + $0xa0] sm:$0xff]  ;;  %v87_v14 = vld [vmem:[#allocation2 + $0x98] sm:$0xff]  ;;  %v86_v15 = vld [vmem:[#allocation2 + $0x90] sm:$0xff] }
  0x22   :  { %103 = vmatpush1.msra.mxu0 %v96_v5  ;;  %v85_v16 = vld [vmem:[#allocation2 + $0x88] sm:$0xff]  ;;  %v1243_v17 = vld [vmem:[%s1534_s1] sm:$0xff]  ;;  %v83_v24 = vld [vmem:[#allocation2 + $0x78] sm:$0xff] }
  0x23   :  { %104 = vmatprep.subr.mxu0 %v95_v6  ;;  %v1248_v18 = vld [vmem:[%s1534_s1 + $0x8] sm:$0xff]  ;;  %v84_v19 = vld [vmem:[#allocation2 + $0x80] sm:$0xff]  ;;  %v310_v20 = vadd.s32 4294967295, %v1243_v17  ;;  %v261_v21 = vadd.s32 4294967294, %v1243_v17  ;;  %v359_v22 = vadd.s32 1, %v1243_v17  ;;  %v1257_v25 = vld [vmem:[%s1534_s1 + $0x10] sm:$0xff] }
  0x24   :  { %105 = vmatpush1.msra.mxu0 %v94_v7  ;;  %v311_v23 = vadd.s32 4294967295, %v1248_v18  ;;  %v262_v26 = vadd.s32 4294967294, %v1248_v18  ;;  %v82_v27 = vld [vmem:[#allocation2 + $0x70] sm:$0xff]  ;;  %v81_v28 = vld [vmem:[#allocation2 + $0x68] sm:$0xff]  ;;  %v312_v29 = vadd.s32 4294967295, %v1257_v25  ;;  %v80_v30 = vld [vmem:[#allocation2 + $0x60] sm:$0xff] }
  0x25   :  { %106 = vmatprep.subr.mxu0 %v93_v8  ;;  %vm314_vm0 = vcmp.ge.s32.totalorder %v310_v20, 0  ;;  %vm318_vm1 = vcmp.lt.s32.totalorder %v310_v20, 16  ;;  %vm265_vm2 = vcmp.ge.s32.totalorder %v261_v21, 0  ;;  %vm269_vm3 = vcmp.lt.s32.totalorder %v261_v21, 16  ;;  %v79_v33 = vld [vmem:[#allocation2 + $0x58] sm:$0xff]  ;;  %v78_v35 = vld [vmem:[#allocation2 + $0x50] sm:$0xff] }
  0x26   :  { %107 = vmatpush1.msra.mxu0 %v92_v9  ;;  %vm322_vm4 = vmand %vm314_vm0, %vm318_vm1  ;;  %vm315_vm5 = vcmp.ge.s32.totalorder %v311_v23, 0  ;;  %vm319_vm6 = vcmp.lt.s32.totalorder %v311_v23, 16  ;;  %vm363_vm8 = vcmp.ge.s32.totalorder %v359_v22, 0  ;;  %vm367_vm9 = vcmp.lt.s32.totalorder %v359_v22, 16  ;;  %v1266_v34 = vld [vmem:[%s1534_s1 + $0x18] sm:$0xff]  ;;  %v77_v37 = vld [vmem:[#allocation2 + $0x48] sm:$0xff] }
  0x27   :  { %108 = vmatprep.subr.mxu0 %v91_v10  ;;  %v326_v31 = vsel %vm322_vm4, 1, %v1171_v1  ;;  %vm273_vm7 = vmand %vm265_vm2, %vm269_vm3  ;;  %v263_v32 = vadd.s32 4294967294, %v1257_v25  ;;  %vm266_vm10 = vcmp.ge.s32.totalorder %v262_v26, 0  ;;  %vm270_vm11 = vcmp.lt.s32.totalorder %v262_v26, 16  ;;  %v76_v41 = vld [vmem:[#allocation2 + $0x40] sm:$0xff]  ;;  %v75_v43 = vld [vmem:[#allocation2 + $0x38] sm:$0xff] }
  0x28   :  { %109 = vmatpush1.msra.mxu0 %v90_v11  ;;  %331 = vperm.xlu0 %1090, %v326_v31   ;;  %v277_v36 = vsel %vm273_vm7, 1, %v1171_v1  ;;  %vm323_vm12 = vmand %vm315_vm5, %vm319_vm6  ;;  %vm316_vm14 = vcmp.ge.s32.totalorder %v312_v29, 0  ;;  %vm320_vm15 = vcmp.lt.s32.totalorder %v312_v29, 16  ;;  %v360_v40 = vadd.s32 1, %v1248_v18  ;;  %v74_v45 = vld [vmem:[#allocation2 + $0x30] sm:$0xff]  ;;  %v73_v48 = vld [vmem:[#allocation2 + $0x28] sm:$0xff] }
  0x29   :  { %110 = vmatprep.subr.mxu0 %v89_v12  ;;  %vm1272_vm13 = vmand %vm363_vm8, %vm367_vm9  ;;  %v327_v39 = vsel %vm323_vm12, 1, %v1171_v1  ;;  %vm267_vm0 = vcmp.ge.s32.totalorder %v263_v32, 0  ;;  %vm271_vm1 = vcmp.lt.s32.totalorder %v263_v32, 16  ;;  %v313_v42 = vadd.s32 4294967295, %v1266_v34  ;;  %v72_v51 = vld [vmem:[#allocation2 + $0x20] sm:$0xff]  ;;  %v71_v53 = vld [vmem:[#allocation2 + $0x18] sm:$0xff] }
  0x2a   :  { %111 = vmatpush1.msra.mxu0 %v88_v13  ;;  %334 = vperm.xlu1 %1091, %v327_v39   ;;  %vm274_vm2 = vmand %vm266_vm10, %vm270_vm11  ;;  %v375_v46 = vsel %vm1272_vm13, 1, %v1171_v1  ;;  %vm364_vm5 = vcmp.ge.s32.totalorder %v360_v40, 0  ;;  %vm368_vm6 = vcmp.lt.s32.totalorder %v360_v40, 16  ;;  %v264_v50 = vadd.s32 4294967294, %v1266_v34  ;;  %v70_v55 = vld [vmem:[#allocation2 + $0x10] sm:$0xff]  ;;  %v69_v58 = vld [vmem:[#allocation2 + $0x8] sm:$0xff] }
  0x2b   :  { %112 = vmatprep.subr.mxu0 %v87_v14  ;;  %v278_v44 = vsel %vm274_vm2, 1, %v1171_v1  ;;  %vm1287_vm3 = vmand %vm316_vm14, %vm320_vm15  ;;  %vm317_vm7 = vcmp.ge.s32.totalorder %v313_v42, 0  ;;  %vm321_vm8 = vcmp.lt.s32.totalorder %v313_v42, 16  ;;  %v361_v52 = vadd.s32 1, %v1257_v25  ;;  %v68_v60 = vld [vmem:[#allocation2] sm:$0xff]  ;;  %v65_v5 = vld [vmem:[%s1533_s0 + $0x8] sm:$0xff] }
  0x2c   :  { %113 = vmatpush1.msra.mxu0 %v86_v15  ;;  %282 = vperm.xlu0 %1090, %v277_v36   ;;  %vm1291_vm4 = vmand %vm267_vm0, %vm271_vm1  ;;  %v328_v54 = vsel %vm1287_vm3, 1, %v1171_v1  ;;  %vm268_vm11 = vcmp.ge.s32.totalorder %v264_v50, 0  ;;  %vm272_vm12 = vcmp.lt.s32.totalorder %v264_v50, 16  ;;  %v408_v59 = vadd.s32 2, %v1243_v17  ;;  %v64_v62 = vld [vmem:[%s1533_s0] sm:$0xff]  ;;  %v66_v9 = vld [vmem:[%s1533_s0 + $0x10] sm:$0xff] }
  0x2d   :  { %114 = vmatprep.subr.mxu0 %v85_v16  ;;  %v279_v56 = vsel %vm1291_vm4, 1, %v1171_v1  ;;  %vm1305_vm9 = vmand %vm364_vm5, %vm368_vm6  ;;  %vm365_vm13 = vcmp.ge.s32.totalorder %v361_v52, 0  ;;  %vm369_vm14 = vcmp.lt.s32.totalorder %v361_v52, 16  ;;  %v409_v61 = vadd.s32 2, %v1248_v18  ;;  %v67_v12 = vld [vmem:[%s1533_s0 + $0x18] sm:$0xff]  ;;  %v478_v18 = vld [vmem:[#allocation5 + $0xf0] sm:$0xff] }
  0x2e   :  { %115 = vmatpush1.msra.mxu0 %v84_v19  ;;  %285 = vperm.xlu1 %1091, %v278_v44   ;;  %vm325_vm10 = vmand %vm317_vm7, %vm321_vm8  ;;  %v376_v63 = vsel %vm1305_vm9, 1, %v1171_v1  ;;  %vm412_vm1 = vcmp.ge.s32.totalorder %v408_v59, 0  ;;  %vm416_vm2 = vcmp.lt.s32.totalorder %v408_v59, 16  ;;  %v362_v3 = vadd.s32 1, %v1266_v34  ;;  %v479_v16 = vld [vmem:[#allocation5 + $0xf8] sm:$0xff]  ;;  %v462_v20 = vld [vmem:[#allocation5 + $0x70] sm:$0xff] }
  0x2f   :  { %116 = vmatprep.subr.mxu0 %v83_v24  ;;  %v329_v2 = vsel %vm325_vm10, 1, %v1171_v1  ;;  %vm276_vm15 = vmand %vm268_vm11, %vm272_vm12  ;;  %vm413_vm3 = vcmp.ge.s32.totalorder %v409_v61, 0  ;;  %vm417_vm4 = vcmp.lt.s32.totalorder %v409_v61, 16  ;;  %v410_v4 = vadd.s32 2, %v1257_v25  ;;  %935 = vmatprep.subr.mxu1 %v479_v16  ;;  %v463_v17 = vld [vmem:[#allocation5 + $0x78] sm:$0xff]  ;;  %v510_v21 = vld [vmem:[#allocation5 + $0x1f0] sm:$0xff] }
  0x30   :  { %117 = vmatpush1.msra.mxu0 %v82_v27  ;;  %380 = vperm.xlu0 %1090, %v375_v46   ;;  %vm373_vm0 = vmand %vm365_vm13, %vm369_vm14  ;;  %v280_v6 = vsel %vm276_vm15, 1, %v1171_v1  ;;  %vm366_vm7 = vcmp.ge.s32.totalorder %v362_v3, 0  ;;  %vm370_vm8 = vcmp.lt.s32.totalorder %v362_v3, 16  ;;  %v411_v8 = vadd.s32 2, %v1266_v34  ;;  %v495_v19 = vld [vmem:[#allocation5 + $0x178] sm:$0xff]  ;;  %v477_v22 = vld [vmem:[#allocation5 + $0xe8] sm:$0xff] }
  0x31   :  { %118 = vmatprep.subr.mxu0 %v81_v28  ;;  %v377_v7 = vsel %vm373_vm0, 1, %v1171_v1  ;;  %vm420_vm5 = vmand %vm412_vm1, %vm416_vm2  ;;  %vm414_vm9 = vcmp.ge.s32.totalorder %v410_v4, 0  ;;  %vm418_vm10 = vcmp.lt.s32.totalorder %v410_v4, 16  ;;  %936 = vmatpush3.msra.mxu1 %v463_v17  ;;  %v494_v23 = vld [vmem:[#allocation5 + $0x170] sm:$0xff]  ;;  %v509_v24 = vld [vmem:[#allocation5 + $0x1e8] sm:$0xff] }
  0x32   :  { %119 = vmatpush1.msra.mxu0 %v80_v30  ;;  %337 = vperm.xlu1 %1091, %v328_v54   ;;  %vm421_vm6 = vmand %vm413_vm3, %vm417_vm4  ;;  %v424_v10 = vsel %vm420_vm5, 1, %v1171_v1  ;;  %vm415_vm13 = vcmp.ge.s32.totalorder %v411_v8, 0  ;;  %vm419_vm14 = vcmp.lt.s32.totalorder %v411_v8, 16  ;;  %v476_v25 = vld [vmem:[#allocation5 + $0xe0] sm:$0xff]  ;;  %v493_v26 = vld [vmem:[#allocation5 + $0x168] sm:$0xff] }
  0x33   :  { %120 = vmatprep.subr.mxu0 %v79_v33  ;;  %v425_v11 = vsel %vm421_vm6, 1, %v1171_v1  ;;  %vm374_vm11 = vmand %vm366_vm7, %vm370_vm8  ;;  %937 = vmatprep.subr.mxu1 %v478_v18  ;;  %v460_v27 = vld [vmem:[#allocation5 + $0x60] sm:$0xff]  ;;  %v475_v29 = vld [vmem:[#allocation5 + $0xd8] sm:$0xff] }
  0x34   :  { %121 = vmatpush1.msra.mxu0 %v78_v35  ;;  %288 = vperm.xlu0 %1090, %v279_v56   ;;  %vm422_vm12 = vmand %vm414_vm9, %vm418_vm10  ;;  %v378_v13 = vsel %vm374_vm11, 1, %v1171_v1  ;;  %v508_v28 = vld [vmem:[#allocation5 + $0x1e0] sm:$0xff]  ;;  %v459_v31 = vld [vmem:[#allocation5 + $0x58] sm:$0xff] }
  0x35   :  { %122 = vmatprep.subr.mxu0 %v77_v37  ;;  %v426_v14 = vsel %vm422_vm12, 1, %v1171_v1  ;;  %vm423_vm15 = vmand %vm415_vm13, %vm419_vm14  ;;  %938 = vmatpush3.msra.mxu1 %v462_v20  ;;  %v492_v30 = vld [vmem:[#allocation5 + $0x160] sm:$0xff]  ;;  %v507_v32 = vld [vmem:[#allocation5 + $0x1d8] sm:$0xff] }
  0x36   :  { %123 = vmatpush1.msra.mxu0 %v76_v41  ;;  %383 = vperm.xlu1 %1091, %v376_v63   ;;  %v427_v15 = vsel %vm423_vm15, 1, %v1171_v1  ;;  %v461_v1 = vld [vmem:[#allocation5 + $0x68] sm:$0xff]  ;;  %v474_v33 = vld [vmem:[#allocation5 + $0xd0] sm:$0xff]  ;;  %v491_v34 = vld [vmem:[#allocation5 + $0x158] sm:$0xff] }
  0x37   :  { %124 = vmatprep.subr.mxu0 %v75_v43  ;;  %939 = vmatprep.subr.mxu1 %v477_v22  ;;  %v458_v35 = vld [vmem:[#allocation5 + $0x50] sm:$0xff]  ;;  %v473_v37 = vld [vmem:[#allocation5 + $0xc8] sm:$0xff]  ;;  %v472_v41 = vld [vmem:[#allocation5 + $0xc0] sm:$0xff] }
  0x38   :  { %125 = vmatpush1.msra.mxu0 %v74_v45  ;;  %340 = vperm.xlu0 %1090, %v329_v2   ;;  %v506_v36 = vld [vmem:[#allocation5 + $0x1d0] sm:$0xff]  ;;  %v457_v39 = vld [vmem:[#allocation5 + $0x48] sm:$0xff]  ;;  %v456_v43 = vld [vmem:[#allocation5 + $0x40] sm:$0xff] }
  0x39   :  { %126 = vmatprep.subr.mxu0 %v73_v48  ;;  %940 = vmatpush3.msra.mxu1 %v461_v1  ;;  %v490_v38 = vld [vmem:[#allocation5 + $0x150] sm:$0xff]  ;;  %v505_v40 = vld [vmem:[#allocation5 + $0x1c8] sm:$0xff]  ;;  %v504_v44 = vld [vmem:[#allocation5 + $0x1c0] sm:$0xff] }
  0x3a   :  { %127 = vmatpush1.msra.mxu0 %v72_v51  ;;  %291 = vperm.xlu1 %1091, %v280_v6   ;;  %v489_v42 = vld [vmem:[#allocation5 + $0x148] sm:$0xff]  ;;  %v471_v45 = vld [vmem:[#allocation5 + $0xb8] sm:$0xff]  ;;  %v488_v46 = vld [vmem:[#allocation5 + $0x140] sm:$0xff] }
  0x3b   :  { %128 = vmatprep.subr.mxu0 %v71_v53  ;;  %941 = vmatprep.subr.mxu1 %v476_v25  ;;  %v455_v47 = vld [vmem:[#allocation5 + $0x38] sm:$0xff]  ;;  %v470_v49 = vld [vmem:[#allocation5 + $0xb0] sm:$0xff]  ;;  %v469_v53 = vld [vmem:[#allocation5 + $0xa8] sm:$0xff] }
  0x3c   :  { %129 = vmatpush1.msra.mxu0 %v70_v55  ;;  %386 = vperm.xlu0 %1090, %v377_v7   ;;  %v503_v48 = vld [vmem:[#allocation5 + $0x1b8] sm:$0xff]  ;;  %v454_v51 = vld [vmem:[#allocation5 + $0x30] sm:$0xff]  ;;  %v453_v55 = vld [vmem:[#allocation5 + $0x28] sm:$0xff] }
  0x3d   :  { %130 = vmatprep.subr.mxu0 %v69_v58  ;;  %942 = vmatpush3.msra.mxu1 %v460_v27  ;;  %v487_v50 = vld [vmem:[#allocation5 + $0x138] sm:$0xff]  ;;  %v502_v52 = vld [vmem:[#allocation5 + $0x1b0] sm:$0xff]  ;;  %v501_v56 = vld [vmem:[#allocation5 + $0x1a8] sm:$0xff] }
  0x3e   :  { %131 = vmatpush1.msra.mxu0 %v68_v60  ;;  %429 = vperm.xlu1 %1091, %v424_v10   ;;  %v486_v54 = vld [vmem:[#allocation5 + $0x130] sm:$0xff]  ;;  %v468_v57 = vld [vmem:[#allocation5 + $0xa0] sm:$0xff]  ;;  %v485_v58 = vld [vmem:[#allocation5 + $0x128] sm:$0xff] }
  0x3f   :  { %165 = vmatmul.mubr.f32.vlgmr.msra.gmra.mxu0 %v64_v62  ;;  %943 = vmatprep.subr.mxu1 %v475_v29  ;;  %v452_v59 = vld [vmem:[#allocation5 + $0x20] sm:$0xff]  ;;  %v467_v61 = vld [vmem:[#allocation5 + $0x98] sm:$0xff]  ;;  %v466_v3 = vld [vmem:[#allocation5 + $0x90] sm:$0xff] }
  0x40   :  { %170 = vmatprep.mubr.f32.mxu0 %v1170_v0  ;;  %432 = vperm.xlu0 %1090, %v425_v11   ;;  %v500_v60 = vld [vmem:[#allocation5 + $0x1a0] sm:$0xff]  ;;  %v451_v63 = vld [vmem:[#allocation5 + $0x18] sm:$0xff]  ;;  %v498_v6 = vld [vmem:[#allocation5 + $0x190] sm:$0xff] }
  0x41   :  { %944 = vmatpush3.msra.mxu1 %v459_v31  ;;  %v484_v62 = vld [vmem:[#allocation5 + $0x120] sm:$0xff]  ;;  %v499_v2 = vld [vmem:[#allocation5 + $0x198] sm:$0xff]  ;;  %v465_v7 = vld [vmem:[#allocation5 + $0x88] sm:$0xff] }
  0x42   :  { %389 = vperm.xlu1 %1091, %v378_v13   ;;  %945 = vmatprep.subr.mxu1 %v474_v33  ;;  %v483_v4 = vld [vmem:[#allocation5 + $0x118] sm:$0xff]  ;;  %v482_v8 = vld [vmem:[#allocation5 + $0x110] sm:$0xff]  ;;  %v497_v10 = vld [vmem:[#allocation5 + $0x188] sm:$0xff] }
  0x43   :  { %171 = vmatmul.mubr.f32.gmra.mxu0 %v65_v5  ;;  %946 = vmatpush3.msra.mxu1 %v458_v35  ;;  %v450_v5 = vld [vmem:[#allocation5 + $0x10] sm:$0xff]  ;;  %v464_v11 = vld [vmem:[#allocation5 + $0x80] sm:$0xff]  ;;  %v1341_v16 = vld [vmem:[#allocation5 + $0x278] sm:$0xff] }
  0x44   :  { %176 = vmatprep.mubr.f32.mxu0 %v1170_v0  ;;  %435 = vperm.xlu0 %1090, %v426_v14   ;;  %v448_v13 = vld [vmem:[#allocation5] sm:$0xff] }
  0x45   :  { %947 = vmatprep.subr.mxu1 %v473_v37  ;;  %v496_v14 = vld [vmem:[#allocation5 + $0x180] sm:$0xff] }
  0x46   :  { %438 = vperm.xlu1 %1091, %v427_v15   ;;  %948 = vmatpush3.msra.mxu1 %v457_v39  ;;  %v480_v15 = vld [vmem:[#allocation5 + $0x100] sm:$0xff] }
  0x47   :  { %177 = vmatmul.mubr.f32.gmra.mxu0 %v66_v9  ;;  %949 = vmatprep.subr.mxu1 %v472_v41  ;;  %v449_v9 = vld [vmem:[#allocation5 + $0x8] sm:$0xff] }
  0x48   :  { %182 = vmatprep.mubr.f32.mxu0 %v1170_v0  ;;  %v511_v0 = vld [vmem:[#allocation5 + $0x1f8] sm:$0xff]  ;;  %950 = vmatpush3.msra.mxu1 %v456_v43 }
  0x49   :  { %979 = vmatprep.subr.mxu0 %v511_v0  ;;  %951 = vmatprep.subr.mxu1 %v471_v45 }
  0x4a   :  { %980 = vmatpush3.msra.mxu0 %v495_v19  ;;  %952 = vmatpush3.msra.mxu1 %v455_v47 }
  0x4b   :  { %183 = vmatmul.mubr.f32.gmra.mxu0 %v67_v12  ;;  %981 = vmatprep.subr.mxu0 %v510_v21  ;;  %v481_v12 = vld [vmem:[#allocation5 + $0x108] sm:$0xff] }
  0x4c   :  { %982 = vmatpush3.msra.mxu0 %v494_v23  ;;  %953 = vmatprep.subr.mxu1 %v470_v49 }
  0x4d   :  { %983 = vmatprep.subr.mxu0 %v509_v24  ;;  %954 = vmatpush3.msra.mxu1 %v454_v51 }
  0x4e   :  { %984 = vmatpush3.msra.mxu0 %v493_v26  ;;  %955 = vmatprep.subr.mxu1 %v469_v53 }
  0x4f   :  { %985 = vmatprep.subr.mxu0 %v508_v28  ;;  %956 = vmatpush3.msra.mxu1 %v453_v55 }
  0x50   :  { %986 = vmatpush3.msra.mxu0 %v492_v30  ;;  %957 = vmatprep.subr.mxu1 %v468_v57 }
  0x51   :  { %987 = vmatprep.subr.mxu0 %v507_v32  ;;  %958 = vmatpush3.msra.mxu1 %v452_v59 }
  0x52   :  { %988 = vmatpush3.msra.mxu0 %v491_v34  ;;  %959 = vmatprep.subr.mxu1 %v467_v61 }
  0x53   :  { %989 = vmatprep.subr.mxu0 %v506_v36  ;;  %960 = vmatpush3.msra.mxu1 %v451_v63 }
  0x54   :  { %990 = vmatpush3.msra.mxu0 %v490_v38  ;;  %961 = vmatprep.subr.mxu1 %v466_v3 }
  0x55   :  { %991 = vmatprep.subr.mxu0 %v505_v40  ;;  %962 = vmatpush3.msra.mxu1 %v450_v5 }
  0x56   :  { %992 = vmatpush3.msra.mxu0 %v489_v42  ;;  %963 = vmatprep.subr.mxu1 %v465_v7 }
  0x57   :  { %993 = vmatprep.subr.mxu0 %v504_v44  ;;  %964 = vmatpush3.msra.mxu1 %v449_v9 }
  0x58   :  { %994 = vmatpush3.msra.mxu0 %v488_v46  ;;  %965 = vmatprep.subr.mxu1 %v464_v11 }
  0x59   :  { %995 = vmatprep.subr.mxu0 %v503_v48  ;;  %966 = vmatpush3.msra.mxu1 %v448_v13 }
  0x5a   :  { %996 = vmatpush3.msra.mxu0 %v487_v50  ;;  %1043 = vmatprep.subr.mxu1 %v1341_v16 }
  0x5b   :  { %997 = vmatprep.subr.mxu0 %v502_v52 }
  0x5c   :  { %998 = vmatpush3.msra.mxu0 %v486_v54 }
  0x5d   :  { %999 = vmatprep.subr.mxu0 %v501_v56 }
  0x5e   :  { %1000 = vmatpush3.msra.mxu0 %v485_v58 }
  0x5f   :  { %1001 = vmatprep.subr.mxu0 %v500_v60 }
  0x60   :  { %1002 = vmatpush3.msra.mxu0 %v484_v62 }
  0x61   :  { %1003 = vmatprep.subr.mxu0 %v499_v2 }
  0x62   :  { %1004 = vmatpush3.msra.mxu0 %v483_v4 }
  0x63   :  { %1005 = vmatprep.subr.mxu0 %v498_v6 }
  0x64   :  { %1006 = vmatpush3.msra.mxu0 %v482_v8 }
  0x65   :  { %1007 = vmatprep.subr.mxu0 %v497_v10 }
  0x66   :  { %1008 = vmatpush3.msra.mxu0 %v481_v12 }
  0x67   :  { %1009 = vmatprep.subr.mxu0 %v496_v14 }
  0x68   :  { %1010 = vmatpush3.msra.mxu0 %v480_v15 }
  0xa5   :  { %v1384_v15 = vpop.permute.xlu1 %334 }
  0xa6   :  { %vm343_vm4 = vcmp.eq.s32.totalorder %v1384_v15, 1 }
  0xff   :  { %v1344_v17 = vpop.f32.mrf.mxu0 }
 0x100   :  { %v199_v24 = vmul.f32 %v1344_v17, %v1344_v17 }
 0x101   :  { %v1346_v0 = vpop.f32.mrf.mxu0 }
 0x102   :  { %v846_v20 = vmul.f32 %v1346_v0, %v1346_v0 }
 0x103   :  { %v1348_v18 = vpop.f32.mrf.mxu0 }
 0x104   :  { %v200_v21 = vmul.f32 %v1348_v18, %v1348_v18  ;;  %v189_v25 = vadd.f32 %v1348_v18, %v1344_v17 }
 0x105   :  { %v1350_v19 = vpop.f32.mrf.mxu0 }
 0x106   :  { %v836_v22 = vadd.f32 %v1350_v19, %v1346_v0  ;;  %v847_v23 = vmul.f32 %v1350_v19, %v1350_v19  ;;  %v203_v29 = vadd.f32 %v200_v21, %v199_v24  ;;  %v1386_v21 = vpop.permute.xlu0 %331 }
 0x107   :  { %v1360_v1 = vpop.f32.mrf.mxu0  ;;  %vm342_vm5 = vcmp.eq.s32.totalorder %v1386_v21, 1  ;;  %v525_v21 = vld [vmem:[#allocation5 + $0x268] sm:$0xff] }
 0x108   :  { %v850_v26 = vadd.f32 %v847_v23, %v846_v20  ;;  %v201_v27 = vmul.f32 %v1360_v1, %v1360_v1  ;;  %v190_v30 = vadd.f32 %v189_v25, %v1360_v1  ;;  %v223_v20 = vlaneseq  ;;  %v1390_v23 = vpop.permute.xlu1 %285  ;;  %v215_v25 = vld [vmem:[%s1536_s3] sm:$0x1] }
 0x109   :  { %v1368_v28 = vpop.f32.mrf.mxu0  ;;  %vm294_vm8 = vcmp.eq.s32.totalorder %v1390_v23, 1  ;;  %v524_v23 = vld [vmem:[#allocation5 + $0x260] sm:$0xff] }
 0x10a   :  { %v837_v31 = vadd.f32 %v836_v22, %v1368_v28  ;;  %v848_v32 = vmul.f32 %v1368_v28, %v1368_v28  ;;  %v204_v34 = vadd.f32 %v203_v29, %v201_v27  ;;  %v1388_v22 = vshrl.u32 %v223_v20, 7  ;;  %v1392_v24 = vpop.permute.xlu0 %282  ;;  %v862_v29 = vld [vmem:[%s1541_s8] sm:$0x1] }
 0x10b   :  { %v1374_v33 = vpop.f32.mrf.mxu0  ;;  %vm293_vm6 = vcmp.eq.s32.totalorder %v1392_v24, 1 }
 0x10c   :  { %v851_v35 = vadd.f32 %v850_v26, %v848_v32  ;;  %v191_v36 = vadd.f32 %v190_v30, %v1374_v33  ;;  %v202_v37 = vmul.f32 %v1374_v33, %v1374_v33  ;;  %v1398_v26 = vsub.s32 0, %v1388_v22  ;;  %v219_v32 = vld [vmem:[%s1537_s4] sm:$0x1] }
 0x10d   :  { %v1379_v38 = vpop.f32.mrf.mxu0  ;;  %vm305_vm0 = vcmp.lt.s32.totalorder %v1388_v22, 1  ;;  %vm354_vm2 = vcmp.lt.s32.totalorder %v1388_v22, 7  ;;  %vm256_vm3 = vcmp.lt.s32.totalorder %v1388_v22, 2  ;;  %vm403_vm14 = vcmp.lt.s32.totalorder %v1388_v22, 6 }
 0x10e   :  { %v192_v39 = vrot.slane %v191_v36, 4  ;;  %v205_v40 = vadd.f32 %v204_v34, %v202_v37  ;;  %v838_v41 = vadd.f32 %v837_v31, %v1379_v38  ;;  %v849_v42 = vmul.f32 %v1379_v38, %v1379_v38  ;;  %v1406_v34 = vpop.permute.xlu1 %337 }
 0x10f   :  { %vm344_vm9 = vcmp.eq.s32.totalorder %v1406_v34, 1 }
 0x110   :  { %v193_v43 = vadd.f32 %v192_v39, %v191_v36  ;;  %v206_v44 = vrot.slane %v205_v40, 4  ;;  %v839_v45 = vrot.slane %v838_v41, 4  ;;  %v852_v46 = vadd.f32 %v851_v35, %v849_v42  ;;  %v381_v39 = vpop.permute.xlu0 %380 }
 0x111   :  { %vm391_vm1 = vcmp.eq.s32.totalorder %v381_v39, 1 }
 0x112   :  { %v194_v47 = vrot.slane %v193_v43, 2  ;;  %v207_v48 = vadd.f32 %v206_v44, %v205_v40  ;;  %v840_v49 = vadd.f32 %v839_v45, %v838_v41  ;;  %v853_v50 = vrot.slane %v852_v46, 4  ;;  %v866_v41 = vld [vmem:[%s1542_s9] sm:$0x1] }
 0x114   :  { %v195_v51 = vadd.f32 %v194_v47, %v193_v43  ;;  %v208_v52 = vrot.slane %v207_v48, 2  ;;  %v841_v53 = vrot.slane %v840_v49, 2  ;;  %v854_v54 = vadd.f32 %v853_v50, %v852_v46 }
 0x116   :  { %v196_v55 = vrot.slane %v195_v51, 1  ;;  %v209_v56 = vadd.f32 %v208_v52, %v207_v48  ;;  %v842_v57 = vadd.f32 %v841_v53, %v840_v49  ;;  %v855_v58 = vrot.slane %v854_v54, 2 }
 0x118   :  { %v197_v59 = vadd.f32 %v196_v55, %v195_v51  ;;  %v210_v60 = vrot.slane %v209_v56, 1  ;;  %v843_v61 = vrot.slane %v842_v57, 1  ;;  %v856_v62 = vadd.f32 %v855_v58, %v854_v54  ;;  %v384_v51 = vpop.permute.xlu1 %383  ;;  %v1422_v54 = vpop.permute.xlu0 %288 }
 0x119   :  { %vm392_vm7 = vcmp.eq.s32.totalorder %v384_v51, 1  ;;  %vm295_vm11 = vcmp.eq.s32.totalorder %v1422_v54, 1 }
 0x11a   :  { %v198_v63 = vmul.f32 0.03125, %v197_v59  ;;  %v211_v2 = vadd.f32 %v210_v60, %v209_v56  ;;  %v844_v3 = vadd.f32 %v843_v61, %v842_v57  ;;  %v857_v4 = vrot.slane %v856_v62, 1 }
 0x11c   :  { %v212_v5 = vmul.f32 0.03125, %v211_v2  ;;  %v213_v6 = vmul.f32 %v198_v63, %v198_v63  ;;  %v845_v7 = vmul.f32 0.03125, %v844_v3  ;;  %v858_v8 = vadd.f32 %v857_v4, %v856_v62  ;;  %v1448_v3 = vpop.permute.xlu1 %291 }
 0x11d   :  { %vm296_vm15 = vcmp.eq.s32.totalorder %v1448_v3, 1 }
 0x11e   :  { %v214_v9 = vsub.f32 %v212_v5, %v213_v6  ;;  %v859_v10 = vmul.f32 0.03125, %v858_v8  ;;  %v860_v11 = vmul.f32 %v845_v7, %v845_v7  ;;  %v341_v8 = vpop.permute.xlu0 %340 }
 0x11f   :  { %vm345_vm12 = vcmp.eq.s32.totalorder %v341_v8, 1 }
 0x120   :  { %v216_v12 = vadd.f32 1e-05, %v214_v9  ;;  %v861_v13 = vsub.f32 %v859_v10, %v860_v11 }
 0x122   :  { %1092 = vrsqrt.f32 %v216_v12  ;;  %v863_v14 = vadd.f32 1e-05, %v861_v13  ;;  %v526_v12 = vld [vmem:[#allocation5 + $0x270] sm:$0xff]  ;;  %v387_v15 = vpop.permute.xlu0 %386 }
 0x123   :  { %vm393_vm10 = vcmp.eq.s32.totalorder %v387_v15, 1 }
 0x124   :  { %1094 = vrsqrt.f32 %v863_v14 }
 0x126   :  { %v433_v51 = vpop.permute.xlu0 %432 }
 0x12f   :  { %v1093_v27 = vpop.eup %1092 }
 0x130   :  { %v218_v30 = vmul.f32 %v1093_v27, %v215_v25  ;;  %v430_v27 = vpop.permute.xlu1 %429 }
 0x131   :  { %v1095_v31 = vpop.eup %1094 }
 0x132   :  { %v220_v35 = vmul.f32 %v218_v30, %v198_v63  ;;  %v226_v36 = vrot.slane %v218_v30, %v1398_v26  ;;  %v865_v37 = vmul.f32 %v1095_v31, %v862_v29 }
 0x134   :  { %v221_v40 = vsub.f32 %v219_v32, %v220_v35  ;;  %v228_v42 = vmul.f32 %v226_v36, %v1344_v17  ;;  %v867_v43 = vmul.f32 %v865_v37, %v845_v7  ;;  %v873_v44 = vrot.slane %v865_v37, %v1398_v26  ;;  %v523_v32 = vld [vmem:[#allocation5 + $0x258] sm:$0xff]  ;;  %v390_v35 = vpop.permute.xlu1 %389 }
 0x135   :  { %v229_v45 = vmul.f32 %v226_v36, %v1348_v18  ;;  %v230_v46 = vmul.f32 %v226_v36, %v1360_v1  ;;  %v231_v47 = vmul.f32 %v226_v36, %v1374_v33  ;;  %v522_v36 = vld [vmem:[#allocation5 + $0x250] sm:$0xff]  ;;  %vm394_vm13 = vcmp.eq.s32.totalorder %v390_v35, 1 }
 0x136   :  { %v236_v48 = vrot.slane %v221_v40, %v1398_v26  ;;  %v868_v49 = vsub.f32 %v866_v41, %v867_v43  ;;  %v878_v50 = vmul.f32 %v873_v44, %v1379_v38  ;;  %v877_v17 = vmul.f32 %v873_v44, %v1368_v28  ;;  %v521_v40 = vld [vmem:[#allocation5 + $0x248] sm:$0xff] }
 0x137   :  { %v875_v52 = vmul.f32 %v873_v44, %v1346_v0  ;;  %v876_v33 = vmul.f32 %v873_v44, %v1350_v19  ;;  %v520_v44 = vld [vmem:[#allocation5 + $0x240] sm:$0xff] }
 0x138   :  { %v241_v53 = vadd.f32 %v236_v48, %v231_v47  ;;  %v238_v55 = vadd.f32 %v236_v48, %v228_v42  ;;  %v239_v18 = vadd.f32 %v236_v48, %v229_v45  ;;  %v240_v56 = vadd.f32 %v236_v48, %v230_v46  ;;  %v519_v46 = vld [vmem:[#allocation5 + $0x238] sm:$0xff]  ;;  %v518_v47 = vld [vmem:[#allocation5 + $0x230] sm:$0xff]  ;;  %v517_v48 = vld [vmem:[#allocation5 + $0x228] sm:$0xff] }
 0x139   :  { %v883_v1 = vrot.slane %v868_v49, %v1398_v26  ;;  %v516_v49 = vld [vmem:[#allocation5 + $0x220] sm:$0xff] }
 0x13a   :  { %v1428_v38 = vmax.f32 %v241_v53, 0.0  ;;  %v1430_v57 = vmax.f32 %v238_v55, 0.0  ;;  %v1432_v28 = vmax.f32 %v239_v18, 0.0  ;;  %v1434_v0 = vmax.f32 %v240_v56, 0.0  ;;  %v512_v53 = vld [vmem:[#allocation5 + $0x200] sm:$0xff]  ;;  %v436_v18 = vpop.permute.xlu0 %435 }
 0x13b   :  { %v1436_v58 = vadd.f32 %v883_v1, %v878_v50  ;;  %v1438_v59 = vadd.f32 %v883_v1, %v877_v17  ;;  %v1440_v60 = vadd.f32 %v883_v1, %v875_v52  ;;  %v1442_v61 = vadd.f32 %v883_v1, %v876_v33  ;;  %v515_v50 = vld [vmem:[#allocation5 + $0x218] sm:$0xff]  ;;  %v514_v17 = vld [vmem:[#allocation5 + $0x210] sm:$0xff]  ;;  %v513_v52 = vld [vmem:[#allocation5 + $0x208] sm:$0xff]  ;;  %v439_v1 = vpop.permute.xlu1 %438 }
 0x13c   :  { %v301_v62 = vrot.slane %v1430_v57, 7  ;;  %v304_v19 = vrot.slane %v1428_v38, 7  ;;  %v350_v63 = vrot.slane %v1430_v57, 1  ;;  %v351_v2 = vrot.slane %v1432_v28, 1 }
 0x13d   :  { %v250_v4 = vrot.slane %v1430_v57, 6  ;;  %v253_v5 = vrot.slane %v1428_v38, 6  ;;  %v302_v6 = vrot.slane %v1432_v28, 7  ;;  %v352_v7 = vrot.slane %v1434_v0, 1 }
 0x13e   :  { %v309_v9 = vsel %vm305_vm0, %v304_v19, %v301_v62  ;;  %v357_v10 = vsel %vm354_vm2, %v350_v63, %v351_v2  ;;  %v251_v13 = vrot.slane %v1432_v28, 6  ;;  %v303_v24 = vrot.slane %v1434_v0, 7 }
 0x13f   :  { %919 = vmatprep.mubr.msk.f32.mxu1 %vm342_vm5, %v309_v9  ;;  %927 = vmatprep.mubr.msk.f32.mxu0 %vm391_vm1, %v357_v10  ;;  %v260_v11 = vsel %vm256_vm3, %v253_v5, %v250_v4  ;;  %v308_v14 = vsel %vm305_vm0, %v301_v62, %v302_v6  ;;  %v356_v20 = vsel %vm354_vm2, %v351_v2, %v352_v7  ;;  %v353_v25 = vrot.slane %v1428_v38, 1 }
 0x140   :  { %920 = vmatmul.mubr.msk.f32.vlgmr.msra.gmra.mxu1 %vm293_vm6, %v260_v11  ;;  %678 = vmatmul.mubr.f32.vlgmr.msra.gmra.mxu0 %v1430_v57  ;;  %v252_v29 = vrot.slane %v1434_v0, 6  ;;  %v307_v30 = vsel %vm305_vm0, %v302_v6, %v303_v24  ;;  %v306_v37 = vsel %vm305_vm0, %v303_v24, %v304_v19  ;;  %v399_v41 = vrot.slane %v1430_v57, 2 }
 0x141   :  { %1044 = vmatpush3.msra.mxu1 %v1341_v16  ;;  %921 = vmatprep.mubr.msk.f32.mxu1 %vm343_vm4, %v308_v14  ;;  %v259_v16 = vsel %vm256_vm3, %v250_v4, %v251_v13  ;;  %v355_v31 = vsel %vm354_vm2, %v352_v7, %v353_v25  ;;  %v358_v39 = vsel %vm354_vm2, %v353_v25, %v350_v63  ;;  %v400_v42 = vrot.slane %v1432_v28, 2 }
 0x142   :  { %928 = vmatprep.mubr.msk.f32.mxu0 %vm392_vm7, %v356_v20  ;;  %1045 = vmatprep.subr.mxu1 %v526_v12  ;;  %v258_v34 = vsel %vm256_vm3, %v251_v13, %v252_v29  ;;  %v257_v43 = vsel %vm256_vm3, %v252_v29, %v253_v5  ;;  %vm440_vm0 = vcmp.eq.s32.totalorder %v430_v27, 1  ;;  %v401_v54 = vrot.slane %v1434_v0, 2 }
 0x143   :  { %1046 = vmatpush3.msra.mxu1 %v526_v12  ;;  %v406_v45 = vsel %vm403_vm14, %v399_v41, %v400_v42  ;;  %v402_v55 = vrot.slane %v1428_v38, 2  ;;  %vm441_vm1 = vcmp.eq.s32.totalorder %v433_v51, 1  ;;  %vm442_vm2 = vcmp.eq.s32.totalorder %v436_v18, 1 }
 0x144   :  { %1047 = vmatprep.subr.mxu1 %v525_v21  ;;  %922 = vmatmul.mubr.msk.f32.gmra.mxu1 %vm294_vm8, %v259_v16  ;;  %v405_v56 = vsel %vm403_vm14, %v400_v42, %v401_v54  ;;  %vm443_vm3 = vcmp.eq.s32.totalorder %v439_v1, 1 }
 0x145   :  { %683 = vmatmul.mubr.f32.gmra.mxu0 %v1432_v28  ;;  %1048 = vmatpush3.msra.mxu1 %v525_v21  ;;  %v404_v33 = vsel %vm403_vm14, %v401_v54, %v402_v55  ;;  %v407_v57 = vsel %vm403_vm14, %v402_v55, %v399_v41 }
 0x146   :  { %923 = vmatprep.mubr.msk.f32.mxu1 %vm344_vm9, %v307_v30  ;;  %929 = vmatprep.mubr.msk.f32.mxu0 %vm393_vm10, %v355_v31 }
 0x147   :  { %1049 = vmatprep.subr.mxu1 %v524_v23 }
 0x148   :  { %1050 = vmatpush3.msra.mxu1 %v524_v23 }
 0x149   :  { %1051 = vmatprep.subr.mxu1 %v523_v32  ;;  %924 = vmatmul.mubr.msk.f32.gmra.mxu1 %vm295_vm11, %v258_v34 }
 0x14a   :  { %688 = vmatmul.mubr.f32.gmra.mxu0 %v1434_v0  ;;  %1052 = vmatpush3.msra.mxu1 %v523_v32 }
 0x14b   :  { %925 = vmatprep.mubr.msk.f32.mxu1 %vm345_vm12, %v306_v37  ;;  %930 = vmatprep.mubr.msk.f32.mxu0 %vm394_vm13, %v358_v39 }
 0x14c   :  { %1053 = vmatprep.subr.mxu1 %v522_v36 }
 0x14d   :  { %1054 = vmatpush3.msra.mxu1 %v522_v36 }
 0x14e   :  { %1055 = vmatprep.subr.mxu1 %v521_v40  ;;  %926 = vmatmul.mubr.msk.f32.gmra.mxu1 %vm296_vm15, %v257_v43 }
 0x14f   :  { %693 = vmatmul.mubr.f32.gmra.mxu0 %v1428_v38  ;;  %1056 = vmatpush3.msra.mxu1 %v521_v40 }
 0x150   :  { %1057 = vmatprep.subr.mxu1 %v520_v44  ;;  %1075 = vmatprep.mubr.msk.f32.mxu1 %vm440_vm0, %v406_v45 }
 0x151   :  { %1058 = vmatpush3.msra.mxu1 %v520_v44 }
 0x152   :  { %1059 = vmatprep.subr.mxu1 %v519_v46 }
 0x153   :  { %1060 = vmatpush3.msra.mxu1 %v519_v46 }
 0x154   :  { %1061 = vmatprep.subr.mxu1 %v518_v47 }
 0x155   :  { %1062 = vmatpush3.msra.mxu1 %v518_v47 }
 0x156   :  { %1063 = vmatprep.subr.mxu1 %v517_v48 }
 0x157   :  { %1064 = vmatpush3.msra.mxu1 %v517_v48 }
 0x158   :  { %1065 = vmatprep.subr.mxu1 %v516_v49 }
 0x159   :  { %1066 = vmatpush3.msra.mxu1 %v516_v49 }
 0x15a   :  { %1067 = vmatprep.subr.mxu1 %v515_v50 }
 0x15b   :  { %1068 = vmatpush3.msra.mxu1 %v515_v50 }
 0x15c   :  { %1069 = vmatprep.subr.mxu1 %v514_v17 }
 0x15d   :  { %1070 = vmatpush3.msra.mxu1 %v514_v17 }
 0x15e   :  { %1071 = vmatprep.subr.mxu1 %v513_v52 }
 0x15f   :  { %1072 = vmatpush3.msra.mxu1 %v513_v52 }
 0x160   :  { %1073 = vmatprep.subr.mxu1 %v512_v53 }
 0x161   :  { %1074 = vmatpush3.msra.mxu1 %v512_v53 }
 0x162   :  { %1076 = vmatmul.mubr.msk.f32.vlgmr.msra.gmra.mxu1 %vm441_vm1, %v405_v56 }
 0x163   :  { %1078 = vmatprep.mubr.msk.f32.mxu1 %vm442_vm2, %v404_v33 }
 0x166   :  { %1079 = vmatmul.mubr.msk.f32.gmra.mxu1 %vm443_vm3, %v407_v57 }
 0x200   :  { %v967_v38 = vpop.f32.mrf.mxu1  ;;  %v1011_v28 = vpop.f32.mrf.mxu0 }
 0x202   :  { %v968_v0 = vpop.f32.mrf.mxu1  ;;  %v1012_v62 = vpop.f32.mrf.mxu0 }
 0x203   :  { %v969_v10 = vadd.f32 %v968_v0, %v967_v38  ;;  %v1013_v11 = vadd.f32 %v1012_v62, %v1011_v28 }
 0x204   :  { %v970_v19 = vpop.f32.mrf.mxu1 }
 0x205   :  { %v1014_v63 = vpop.f32.mrf.mxu0  ;;  %v680_v24 = vadd.f32 %v1013_v11, %v969_v10 }
 0x206   :  { %v971_v2 = vpop.f32.mrf.mxu1 }
 0x207   :  { %v1015_v3 = vpop.f32.mrf.mxu0  ;;  %v972_v12 = vadd.f32 %v971_v2, %v970_v19  ;;  %v809_v19 = vld [vmem:[%s1539_s6] sm:$0x1]  ;;  %s1172_s6 = smov [#allocation7]  }
 0x208   :  { %v1016_v22 = vadd.f32 %v1015_v3, %v1014_v63  ;;  %v813_v3 = vld [vmem:[%s1540_s7] sm:$0x1]  ;;  %s906_s27 = sshll.u32 %s1172_s6, 4  ;;  %s907_s27 = int_to_ptr.vmem [resolvable:$true] %s906_s27 }
 0x209   :  { %v973_v4 = vpop.f32.mrf.mxu1  ;;  %s1138_s7 = scalar_lea.vmem %s907_s27, 512  ;;  %p1143_p11 = scmp.lt.s32.totalorder %s907_s27, %s907_s27 }
 0x20a   :  { %v1017_v5 = vpop.f32.mrf.mxu0  ;;  %v685_v20 = vadd.f32 %v1016_v22, %v972_v12  ;;  %p1139_p10 = scmp.ne.s32.totalorder %s907_s27, %s1138_s7  ;;  %p1144_p12 = scmp.lt.s32.totalorder %s1138_s7, %s1138_s7 }
 0x20b   :  { %v974_v6 = vpop.f32.mrf.mxu1 }
 0x20c   :  { %v1018_v7 = vpop.f32.mrf.mxu0  ;;  %v975_v25 = vadd.f32 %v974_v6, %v973_v4  ;;  %p1145_p13 = por %p1144_p12, %p1143_p11 }
 0x20d   :  { %v1019_v27 = vadd.f32 %v1018_v7, %v1017_v5 }
 0x20e   :  { %v976_v8 = vpop.f32.mrf.mxu1  ;;  %p1146_p0 = pnand %p1145_p13, %p1139_p10 }
 0x20f   :  { %v1020_v9 = vpop.f32.mrf.mxu0  ;;  %v690_v35 = vadd.f32 %v1019_v27, %v975_v25 }
 0x210   :  { %v977_v13 = vpop.f32.mrf.mxu1 }
 0x211   :  { %v1021_v14 = vpop.f32.mrf.mxu0  ;;  %v978_v16 = vadd.f32 %v977_v13, %v976_v8 }
 0x212   :  { %v1022_v15 = vadd.f32 %v1021_v14, %v1020_v9 }
 0x214   :  { %v695_v34 = vadd.f32 %v1022_v15, %v978_v16 }
 0x222   :  { %v1077_v21 = vpop.f32.mrf.mxu1 }
 0x223   :  { %v770_v29 = vadd.f32 %v1077_v21, %v685_v20 }
 0x224   :  { %v764_v23 = vpop.f32.mrf.mxu1 }
 0x225   :  { %v765_v30 = vadd.f32 %v764_v23, %v680_v24  ;;  %v794_v37 = vmul.f32 %v770_v29, %v770_v29 }
 0x226   :  { %v1080_v31 = vpop.f32.mrf.mxu1 }
 0x227   :  { %v793_v32 = vmul.f32 %v765_v30, %v765_v30  ;;  %v783_v39 = vadd.f32 %v770_v29, %v765_v30  ;;  %v780_v40 = vadd.f32 %v1080_v31, %v695_v34 }
 0x228   :  { %v774_v36 = vpop.f32.mrf.mxu1 }
 0x229   :  { %v775_v41 = vadd.f32 %v774_v36, %v690_v35  ;;  %v797_v42 = vadd.f32 %v794_v37, %v793_v32  ;;  %v796_v45 = vmul.f32 %v780_v40, %v780_v40 }
 0x22b   :  { %v784_v43 = vadd.f32 %v783_v39, %v775_v41  ;;  %v795_v44 = vmul.f32 %v775_v41, %v775_v41 }
 0x22d   :  { %v785_v46 = vadd.f32 %v784_v43, %v780_v40  ;;  %v798_v47 = vadd.f32 %v797_v42, %v795_v44 }
 0x22f   :  { %v786_v48 = vrot.slane %v785_v46, 4  ;;  %v799_v49 = vadd.f32 %v798_v47, %v796_v45 }
 0x231   :  { %v787_v50 = vadd.f32 %v786_v48, %v785_v46  ;;  %v800_v51 = vrot.slane %v799_v49, 4 }
 0x233   :  { %v788_v17 = vrot.slane %v787_v50, 2  ;;  %v801_v52 = vadd.f32 %v800_v51, %v799_v49 }
 0x235   :  { %v789_v53 = vadd.f32 %v788_v17, %v787_v50  ;;  %v802_v54 = vrot.slane %v801_v52, 2 }
 0x237   :  { %v790_v55 = vrot.slane %v789_v53, 1  ;;  %v803_v18 = vadd.f32 %v802_v54, %v801_v52 }
 0x239   :  { %v791_v56 = vadd.f32 %v790_v55, %v789_v53  ;;  %v804_v1 = vrot.slane %v803_v18, 1 }
 0x23b   :  { %v792_v33 = vmul.f32 0.03125, %v791_v56  ;;  %v805_v57 = vadd.f32 %v804_v1, %v803_v18 }
 0x23d   :  { %v806_v38 = vmul.f32 0.03125, %v805_v57  ;;  %v807_v28 = vmul.f32 %v792_v33, %v792_v33 }
 0x23f   :  { %v808_v0 = vsub.f32 %v806_v38, %v807_v28 }
 0x241   :  { %v810_v62 = vadd.f32 1e-05, %v808_v0 }
 0x243   :  { %1096 = vrsqrt.f32 %v810_v62 }
 0x250   :  { %v1097_v63 = vpop.eup %1096 }
 0x251   :  { %v812_v2 = vmul.f32 %v1097_v63, %v809_v19 }
 0x253   :  { %v814_v4 = vmul.f32 %v812_v2, %v792_v33  ;;  %v820_v5 = vrot.slane %v812_v2, %v1398_v26 }
 0x255   :  { %v815_v6 = vsub.f32 %v813_v3, %v814_v4  ;;  %v824_v7 = vmul.f32 %v820_v5, %v775_v41  ;;  %v822_v9 = vmul.f32 %v820_v5, %v765_v30  ;;  %v823_v10 = vmul.f32 %v820_v5, %v770_v29 }
 0x256   :  { %v825_v11 = vmul.f32 %v820_v5, %v780_v40 }
 0x257   :  { %v830_v8 = vrot.slane %v815_v6, %v1398_v26 }
 0x259   :  { %v834_v12 = vadd.f32 %v830_v8, %v824_v7  ;;  %v832_v22 = vadd.f32 %v830_v8, %v822_v9  ;;  %v833_v13 = vadd.f32 %v830_v8, %v823_v10  ;;  %v835_v14 = vadd.f32 %v830_v8, %v825_v11 }
 0x25b   :  { %v891_v20 = vadd.f32 %v1438_v59, %v834_v12  ;;  %v889_v21 = vadd.f32 %v1440_v60, %v832_v22  ;;  %v890_v24 = vadd.f32 %v1442_v61, %v833_v13  ;;  %v892_v25 = vadd.f32 %v1436_v58, %v835_v14 }
 0x25d   :  { %v895_v27 = vmax.f32 %v891_v20, 0.0  ;;  %v893_v16 = vmax.f32 %v889_v21, 0.0  ;;  %v894_v26 = vmax.f32 %v890_v24, 0.0  ;;  %v896_v15 = vmax.f32 %v892_v25, 0.0 }
 0x25f   :  { %899 = vst [vmem:[#allocation7 + $0x10] sm:$0xff] %v895_v27  ;;  %897 = vst [vmem:[#allocation7] sm:$0xff] %v893_v16 }
 0x260   :  { %898 = vst [vmem:[#allocation7 + $0x8] sm:$0xff] %v894_v26  ;;  %900 = vst [vmem:[#allocation7 + $0x18] sm:$0xff] %v896_v15 }
 0x261   :  { %1149 = shalt.err (!%p1146_p0)
}
 0x262   :  { %912 = dma.vmem_to_hbm [thread:$0]  %s907_s27, 512, %s1543_s10, [#allocation4], %s1168_s23, %s1168_s23, %s1169_s24  }
 0x263   :  { %1162 = dma.done.wait [#allocation4], 512  }
 0x264   :  { %1163 = vsyncadd [#allocation4], 4294966784 }
 0x265   :  { %916 = vsyncpa [#allocation3], 1 }
 0x266   :  { %917 = vsyncpa [#allocation6], 1 }
 0x267   :  { %918 = vsyncpa [#allocation4], 1 }

</bundles_post_ra>
